<compile_context>
chip_gen: v5e
topology: v5e:2x2
jax: 0.10.0
libtpu: 0.0.40
codegen_flags: <defaults>
</compile_context>

<pallas_src>
from functools import partial

import jax
import jax.numpy as jnp
from jax.experimental import pallas as pl
from jax.experimental.pallas import tpu as pltpu


def _round_up(x: int, m: int) -> int:
    return (x + m - 1) // m * m


# ----------------------------------------------------------------------------
# Kernel: causal per-timestep linear score head (one row-tile per grid step)
#   x_ref: (tm, D)  VMEM     w_ref: (1, D)  VMEM (resident, constant index map)
#   b_ref: (1,)     SMEM     o_ref: (tm, 1) VMEM
# ----------------------------------------------------------------------------
def _linear_head_kernel(x_ref, w_ref, b_ref, o_ref):
    x = x_ref[...].astype(jnp.float32)          # (tm, D)
    w = w_ref[...].astype(jnp.float32)          # (1, D)  broadcast over rows
    # VPU broadcast-multiply + XLU lane reduction; f32 accumulation.
    acc = jnp.sum(x * w, axis=-1, keepdims=True)  # (tm, 1)
    o_ref[...] = (acc + b_ref[0]).astype(o_ref.dtype)


@partial(jax.jit, static_argnames=("tm",))
def linear_score_head(features: jax.Array, w: jax.Array, b: jax.Array,
                      tm: int = 512) -> jax.Array:
    """features: (B, S, D) -> scores (B, S, 1) float32.

    w: (1, D) lane-dense weight, b: (1,) bias.
    """
    B, S, D = features.shape
    M = B * S
    x2d = features.reshape(M, D)

    # Tile size: target ~512 rows, cap the per-buffer VMEM footprint (~4 MiB
    # per input buffer => ~8 MiB double-buffered; safe on v5e 16 MiB scoped
    # VMEM and v7x 32 MiB / 64 MiB physical), multiple of 8 sublanes.
    bytes_per_row = D * 4
    tm_cap = max(8, (4 * 1024 * 1024) // bytes_per_row)
    tm_eff = min(tm, tm_cap, _round_up(M, 8))
    tm_eff = max(8, (tm_eff // 8) * 8)

    # Pad rows to a multiple of the tile size (padded rows are discarded).
    M_pad = _round_up(M, tm_eff)
    if M_pad != M:
        x2d = jnp.pad(x2d, ((0, M_pad - M), (0, 0)))

    grid = (M_pad // tm_eff,)

    out = pl.pallas_call(
        _linear_head_kernel,
        out_shape=jax.ShapeDtypeStruct((M_pad, 1), jnp.float32),
        grid_spec=pltpu.PrefetchScalarGridSpec(
            num_scalar_prefetch=0,
            grid=grid,
            in_specs=[
                # Row-tiles of the feature slab: pipelined / double-buffered.
                pl.BlockSpec((tm_eff, D), lambda i: (i, 0)),
                # Weight stays resident across all grid steps (constant map).
                pl.BlockSpec((1, D), lambda i: (0, 0)),
                # Bias: single scalar in SMEM (no VMEM tile / vector load).
                pl.BlockSpec(memory_space=pltpu.MemorySpace.SMEM),
            ],
            out_specs=pl.BlockSpec((tm_eff, 1), lambda i: (i, 0)),
        ),
        compiler_params=pltpu.CompilerParams(
            # Row-tiles are independent -> shard across both TCs on v7x.
            dimension_semantics=("parallel",),
        ),
    )(x2d, w, b)

    return out[:M].reshape(B, S, 1)


# ----------------------------------------------------------------------------
# Regularization loss: lambda_reg * sum(W**2) over non-bias params.
# Plain JAX: the reduction is a few hundred ns of work; a pallas_call launch
# would be strictly slower.  No host sync (returns traced scalar).
# ----------------------------------------------------------------------------
def regularization_loss(w: jax.Array, lambda_reg: float) -> jax.Array:
    return lambda_reg * jnp.sum(jnp.square(w.astype(jnp.float32)))


# ----------------------------------------------------------------------------
# Model wrapper (deterministic synthetic parameters, no checkpoint loading)
# ----------------------------------------------------------------------------
class BaseModelPallas:
    def __init__(self, input_dim: int, key: jax.Array, lambda_reg: float = 1e-4):
        self.input_dim = input_dim
        self.lambda_reg = lambda_reg
        k_w, _ = jax.random.split(key)
        # Lane-dense (1, D) weight; bias kept separate (excluded from reg).
        self.weight = (jax.random.normal(k_w, (1, input_dim), jnp.float32)
                       / jnp.sqrt(jnp.float32(input_dim)))
        self.bias = jnp.zeros((1,), jnp.float32)

    def _scale_weights(self, scale_factor: float):
        # Mirrors BaseModel._scale_weights: scale weights, leave biases alone.
        self.weight = self.weight * scale_factor

    def forward(self, batch: dict) -> jax.Array:
        features = batch["features"]  # (B, S, D)
        return linear_score_head(features, self.weight, self.bias)

    def compute_regularization_loss(self, lambda_reg: float):
        if lambda_reg == 0.0:
            return jnp.float32(0.0), {}
        reg = regularization_loss(self.weight, lambda_reg)
        # Return the traced scalar in logs as well (no float() -> no host sync
        # inside the training step; the logger can pull it asynchronously).
        return reg, {"reg_loss": reg}

    # TODO(synk): forward_compute_loss / train_epoch / get_optimizer are
    # training-loop / optimizer plumbing with no Pallas kernel equivalent.


if __name__ == "__main__":
    key = jax.random.PRNGKey(0)
    k_model, k_feat = jax.random.split(key)

    B, S, D = 2, 8, 32
    model = BaseModelPallas(input_dim=D, key=k_model, lambda_reg=1e-4)
    features = jax.random.normal(k_feat, (B, S, D), jnp.float32)
    batch = {"features": features}

    scores = model.forward(batch)
    scores = jax.block_until_ready(scores)
    assert scores.shape == (B, S, 1), scores.shape

    # Reference check for the linear head.
    ref = features.reshape(B * S, D) @ model.weight.reshape(D, 1) + model.bias[0]
    ref = ref.reshape(B, S, 1)
    assert jnp.allclose(scores, ref, atol=1e-5, rtol=1e-5)

    reg, logs = model.compute_regularization_loss(model.lambda_reg)
    reg = jax.block_until_ready(jnp.asarray(reg))
    ref_reg = model.lambda_reg * jnp.sum(model.weight ** 2)
    assert jnp.allclose(reg, ref_reg, atol=1e-6, rtol=1e-5)

    print("KERNEL_OK")
</pallas_src>

<mosaic_0001>
module attributes {stable_mosaic.version = 11 : i64} {
  func.func @_linear_head_kernel(%arg0: i32, %arg1: memref<16x32xf32, #tpu.memory_space<vmem>>, %arg2: memref<1x32xf32, #tpu.memory_space<vmem>>, %arg3: memref<1xf32, #tpu.memory_space<smem>>, %arg4: memref<16x1xf32, #tpu.memory_space<vmem>>) attributes {dimension_semantics = [#tpu.dimension_semantics<parallel>], iteration_bounds = array<i64: 1>, scalar_prefetch = 0 : i64, scratch_operands = 0 : i64, tpu.core_type = #tpu.core_type<tc>, window_params = [{transform_indices = @transform_0, window_bounds = array<i64: 16, 32>}, {pipeline_mode = #tpu.pipeline_mode<synchronous>, transform_indices = @transform_1, window_bounds = array<i64: 1, 32>}, {transform_indices = @transform_2, window_bounds = array<i64: 1>}, {transform_indices = @transform_3, window_bounds = array<i64: 16, 1>}]} {
    %c0 = arith.constant 0 : index
    %c0_0 = arith.constant 0 : index
    %0 = vector.load %arg1[%c0, %c0_0] : memref<16x32xf32, #tpu.memory_space<vmem>>, vector<16x32xf32>
    %c0_1 = arith.constant 0 : index
    %c0_2 = arith.constant 0 : index
    %1 = vector.load %arg2[%c0_1, %c0_2] : memref<1x32xf32, #tpu.memory_space<vmem>>, vector<1x32xf32>
    %2 = vector.broadcast %1 : vector<1x32xf32> to vector<16x32xf32>
    %3 = arith.mulf %0, %2 : vector<16x32xf32>
    %cst = arith.constant dense<0.000000e+00> : vector<16xf32>
    %4 = vector.multi_reduction <add>, %3, %cst [1] : vector<16x32xf32> to vector<16xf32>
    %5 = vector.shape_cast %4 : vector<16xf32> to vector<16x1xf32>
    %c0_3 = arith.constant 0 : index
    %6 = memref.load %arg3[%c0_3] : memref<1xf32, #tpu.memory_space<smem>>
    %7 = vector.broadcast %6 : f32 to vector<16x1xf32>
    %8 = arith.addf %5, %7 : vector<16x1xf32>
    %c0_4 = arith.constant 0 : index
    %c0_5 = arith.constant 0 : index
    %9 = vector.load %arg4[%c0_4, %c0_5] : memref<16x1xf32, #tpu.memory_space<vmem>>, vector<16x1xf32>
    tpu.vector_store %arg4[%c0_4, %c0_5], %8 {strides = array<i32>} : memref<16x1xf32, #tpu.memory_space<vmem>>, vector<16x1xf32>,
    return
  }
  func.func @transform_0(%arg0: i32) -> (i32, i32) {
    %c0_i32 = arith.constant 0 : i32
    %c0_i32_0 = arith.constant 0 : i32
    return %arg0, %c0_i32 : i32, i32
  }
  func.func @transform_1(%arg0: i32) -> (i32, i32) {
    %c0_i32 = arith.constant 0 : i32
    %c0_i32_0 = arith.constant 0 : i32
    %c0_i32_1 = arith.constant 0 : i32
    return %c0_i32, %c0_i32_0 : i32, i32
  }
  func.func @transform_2(%arg0: i32) -> i32 {
    %c0_i32 = arith.constant 0 : i32
    %c0_i32_0 = arith.constant 0 : i32
    return %c0_i32 : i32
  }
  func.func @transform_3(%arg0: i32) -> (i32, i32) {
    %c0_i32 = arith.constant 0 : i32
    %c0_i32_0 = arith.constant 0 : i32
    return %arg0, %c0_i32 : i32, i32
  }
}

</mosaic_0001>

<bundles_post_ra>
// kernel: linear_score_head.1
= control target key start
LH: loop header
LB: loop body
LE: loop exit
PB: predicated region body
PF: predicated region fallthrough
CT: control target
= control target key end

     0   :  { %9 = vsyncpa [#allocation4], 0  ;;  %s88_s15 = smov [#allocation3]   ;;  %s89_s17 = smov 128   ;;  %s126_s0 = inlined_call_operand.hbm [shape: f32[16,32], index: 0, kind: input, shape index: {}]   ;;  %s127_s1 = inlined_call_operand.vmem [shape: f32[1,32], index: 1, kind: input, shape index: {}]   ;;  %s128_s2 = inlined_call_operand.<no memory space> [shape: f32[1], index: 2, kind: input, shape index: {}]   ;;  %s129_s3 = inlined_call_operand.vmem [shape: f32[16,1], index: 3, kind: output, shape index: {}]  }
   0x1   :  { %s14_s14 = sshll.u32 %s126_s0, 4  ;;  %s16_s16 = sshll.u32 %s88_s15, 4  ;;  %s15_s14 = int_to_ptr.hbm [resolvable:$true] %s14_s14  ;;  %s17_s16 = int_to_ptr.vmem [resolvable:$true] %s16_s16 }
   0x2   :  { %s90_s18 = smov 8  }
   0x3   :  { %22 = dma.hbm_to_vmem [thread:$0]  %s15_s14, 256, %s17_s16, [#allocation4], %s89_s17, %s89_s17, %s90_s18  }
   0x4   :  { %86 = dma.done.wait [#allocation4], 256  }
   0x5   :  { %87 = vsyncadd [#allocation4], 4294967040  ;;  %v31_v0 = vld [vmem:[#allocation3] sm:$0xff]  ;;  %vm39_vm0 = vcmask 261120   ;;  %v32_v3 = vld [vmem:[#allocation3 + $0x8] sm:$0xff]  ;;  %v47_v7 = vstv %s128_s2  ;;  %vm50_vm1 = vcmask 7168  }
   0x6   :  { %v61_v1 = vld [vmem:[%s127_s1] ss:$0 sm:$0xff] }
   0x7   :  { %v37_v2 = vmul.f32 %v61_v1, %v31_v0  ;;  %v38_v5 = vmul.f32 %v61_v1, %v32_v3 }
   0x9   :  { %v40_v4 = vsel %vm39_vm0, %v37_v2, 0.0  ;;  %v43_v6 = vsel %vm39_vm0, %v38_v5, 0.0 }
   0xa   :  { %41 = vadd.xlane.f32.xlu0 %v40_v4 }
  0x12   :  { %44 = vadd.xlane.f32.xlu0 %v43_v6 }
  0x7d   :  { %v42_v8 = vpop.xlane.xlu0 %41 }
  0x7e   :  { %v48_v9 = vadd.f32 %v47_v7, %v42_v8 }
  0x80   :  { %51 = vst.msk [vmem:[%s129_s3] sm:$0xff] %vm50_vm1, %v48_v9 }
  0x85   :  { %v45_v10 = vpop.xlane.xlu0 %44 }
  0x86   :  { %v49_v11 = vadd.f32 %v47_v7, %v45_v10 }
  0x88   :  { %52 = vst.msk [vmem:[%s129_s3 + $0x8] sm:$0xff] %vm50_vm1, %v49_v11 }
  0x89   :  { %57 = vsyncpa [#allocation4], 1 }

</bundles_post_ra>
